<compile_context>
chip_gen: v7x
topology: tpu7x:2x2x1
jax: 0.10.0
libtpu: 0.0.40
codegen_flags: <defaults>
</compile_context>

<pallas_src>
import functools

import numpy as np
import jax
import jax.numpy as jnp
from jax.experimental import pallas as pl
from jax.experimental.pallas import tpu as pltpu

LANE = 128
FUSED_MAX_N = 512            # single fused block for small graphs
RESIDENT_BUDGET = 8 << 20    # keep aggregation RHS VMEM-resident up to 8 MiB


def _round_up(n, m):
    return ((n + m - 1) // m) * m


def _pick_tile(n_pad):
    """Largest tile <= 1024 dividing n_pad with >= 2 row tiles (v7x megacore)."""
    for t in (1024, 512, 256, 128):
        if n_pad % t == 0 and n_pad // t >= 2:
            return t
    return 128


# ---------------------------------------------------------------------------
# Kernels
# ---------------------------------------------------------------------------
def _fused_small_kernel(a_ref, z1_ref, b1_ref, w2_ref, b2_ref, out_ref, *, valid_cols):
    """Whole-graph fused forward: log_softmax(A @ (relu(A@z1+b1) @ W2) + b2)."""
    a = a_ref[...]
    h = jnp.dot(a, z1_ref[...], preferred_element_type=jnp.float32)
    h = jnp.maximum(h + b1_ref[...], 0.0)
    z2 = jnp.dot(h.astype(jnp.bfloat16), w2_ref[...], preferred_element_type=jnp.float32)
    logits = jnp.dot(a, z2.astype(jnp.bfloat16), preferred_element_type=jnp.float32)
    logits = logits + b2_ref[...]
    col = jax.lax.broadcasted_iota(jnp.int32, logits.shape, 1)
    logits = jnp.where(col < valid_cols, logits, -1e30)
    m = jnp.max(logits, axis=1, keepdims=True)
    shifted = logits - m
    lse = jnp.log(jnp.sum(jnp.exp(shifted), axis=1, keepdims=True))
    out_ref[...] = shifted - lse


def _layer1_z1_kernel(a_ref, z1_ref, b1_ref, w2_ref, z2_ref, acc_ref, *, tk, rhs_resident):
    """z2_tile = relu((A @ z1) tile + b1) @ W2  (z1 = X @ W1 precomputed)."""
    k = pl.program_id(1)

    @pl.when(k == 0)
    def _():
        acc_ref[...] = jnp.zeros_like(acc_ref)

    if rhs_resident:
        rhs = z1_ref[pl.ds(pl.multiple_of(k * tk, tk), tk), :]
    else:
        rhs = z1_ref[...]
    acc_ref[...] += jnp.dot(a_ref[...], rhs, preferred_element_type=jnp.float32)

    @pl.when(k == pl.num_programs(1) - 1)
    def _():
        h = jnp.maximum(acc_ref[...] + b1_ref[...], 0.0)
        z2 = jnp.dot(h.astype(jnp.bfloat16), w2_ref[...], preferred_element_type=jnp.float32)
        z2_ref[...] = z2.astype(z2_ref.dtype)


def _layer1_x_kernel(a_ref, x_ref, w1_ref, b1_ref, w2_ref, z2_ref, acc_ref, *, tk, rhs_resident):
    """z2_tile = relu(((A @ X) tile) @ W1 + b1) @ W2  (used when fin_p < hid_p)."""
    k = pl.program_id(1)

    @pl.when(k == 0)
    def _():
        acc_ref[...] = jnp.zeros_like(acc_ref)

    if rhs_resident:
        rhs = x_ref[pl.ds(pl.multiple_of(k * tk, tk), tk), :]
    else:
        rhs = x_ref[...]
    acc_ref[...] += jnp.dot(a_ref[...], rhs, preferred_element_type=jnp.float32)

    @pl.when(k == pl.num_programs(1) - 1)
    def _():
        h = jnp.dot(acc_ref[...].astype(jnp.bfloat16), w1_ref[...],
                    preferred_element_type=jnp.float32)
        h = jnp.maximum(h + b1_ref[...], 0.0)
        z2 = jnp.dot(h.astype(jnp.bfloat16), w2_ref[...], preferred_element_type=jnp.float32)
        z2_ref[...] = z2.astype(z2_ref.dtype)


def _layer2_kernel(a_ref, z2_ref, b2_ref, out_ref, acc_ref, *, tk, rhs_resident, valid_cols):
    """out_tile = log_softmax((A @ z2) tile + b2) over the first `valid_cols` columns."""
    k = pl.program_id(1)

    @pl.when(k == 0)
    def _():
        acc_ref[...] = jnp.zeros_like(acc_ref)

    if rhs_resident:
        rhs = z2_ref[pl.ds(pl.multiple_of(k * tk, tk), tk), :]
    else:
        rhs = z2_ref[...]
    acc_ref[...] += jnp.dot(a_ref[...], rhs, preferred_element_type=jnp.float32)

    @pl.when(k == pl.num_programs(1) - 1)
    def _():
        logits = acc_ref[...] + b2_ref[...]
        col = jax.lax.broadcasted_iota(jnp.int32, logits.shape, 1)
        logits = jnp.where(col < valid_cols, logits, -1e30)
        m = jnp.max(logits, axis=1, keepdims=True)
        shifted = logits - m
        lse = jnp.log(jnp.sum(jnp.exp(shifted), axis=1, keepdims=True))
        out_ref[...] = shifted - lse


# ---------------------------------------------------------------------------
# Wrapper
# ---------------------------------------------------------------------------
def gcn_forward(x, adj_norm, w1, b1, w2, b2):
    """Pallas GCN forward: log_softmax(A @ relu(A @ (x @ W1) + b1) @ W2 + b2)."""
    n, fin = x.shape
    hid = w1.shape[1]
    out_c = w2.shape[1]

    n_pad = _round_up(n, LANE)
    fin_p = _round_up(fin, LANE)
    hid_p = _round_up(hid, LANE)
    c_p = _round_up(out_c, LANE)

    def pad2(a, r, c):
        a = a.astype(jnp.float32)
        return jnp.pad(a, ((0, r - a.shape[0]), (0, c - a.shape[1])))

    a_p = pad2(adj_norm, n_pad, n_pad).astype(jnp.bfloat16)   # big O(N^2) operand -> bf16
    b1_p = pad2(b1.reshape(1, -1), 1, hid_p)                  # biases / softmax stay f32
    b2_p = pad2(b2.reshape(1, -1), 1, c_p)
    w2_p = pad2(w2, hid_p, c_p).astype(jnp.bfloat16)

    # ---- small-N fast path: one fused call, single A stream, z2 stays in VMEM ----
    if n_pad <= FUSED_MAX_N:
        z1_p = pad2(x @ w1, n_pad, hid_p).astype(jnp.bfloat16)   # tiny dense matmul via XLA
        out_p = pl.pallas_call(
            functools.partial(_fused_small_kernel, valid_cols=out_c),
            out_shape=jax.ShapeDtypeStruct((n_pad, c_p), jnp.float32),
            cost_estimate=pl.CostEstimate(
                flops=2 * n_pad * n_pad * (hid_p + c_p) + 2 * n_pad * hid_p * c_p,
                transcendentals=n_pad * c_p + n_pad,
                bytes_accessed=2 * n_pad * n_pad + 2 * n_pad * hid_p
                + 2 * hid_p * c_p + 4 * n_pad * c_p,
            ),
        )(a_p, z1_p, b1_p, w2_p, b2_p)
        return out_p[:n, :out_c]

    # ---- tiled two-call path for larger graphs ----
    tm = tk = _pick_tile(n_pad)
    grid = (n_pad // tm, n_pad // tk)

    # Cheaper reassociation: aggregate over min(fin_p, hid_p).
    use_z1 = hid_p <= fin_p
    if use_z1:
        rhs1 = pad2(x @ w1, n_pad, hid_p).astype(jnp.bfloat16)
        rhs1_w = hid_p
        acc1_w = hid_p
        w1_p = None
    else:
        rhs1 = pad2(x, n_pad, fin_p).astype(jnp.bfloat16)
        rhs1_w = fin_p
        acc1_w = fin_p
        w1_p = pad2(w1, fin_p, hid_p).astype(jnp.bfloat16)

    rhs1_resident = (n_pad * rhs1_w * 2) <= RESIDENT_BUDGET
    z2_resident = (n_pad * c_p * 2) <= RESIDENT_BUDGET

    def cparams(vmem_est):
        limit = max(32 << 20, min(64 << 20, 2 * int(vmem_est)))   # 64 MiB = v7x ceiling
        return pltpu.CompilerParams(
            dimension_semantics=("parallel", "arbitrary"),
            vmem_limit_bytes=limit,
        )

    # ---------------- layer 1: aggregate + (W1) + bias + relu + W2, fused ----------------
    rhs1_spec = (pl.BlockSpec((n_pad, rhs1_w), lambda i, k: (0, 0)) if rhs1_resident
                 else pl.BlockSpec((tk, rhs1_w), lambda i, k: (k, 0)))

    rhs1_blk_bytes = (n_pad if rhs1_resident else tk) * rhs1_w * 2
    l1_vmem = (2 * tm * tk * 2 + 2 * rhs1_blk_bytes + 2 * hid_p * c_p * 2
               + 2 * hid_p * 4 + 2 * tm * c_p * 2 + tm * acc1_w * 4)
    if not use_z1:
        l1_vmem += 2 * fin_p * hid_p * 2

    rhs1_fetches = 1 if rhs1_resident else (n_pad // tm)
    l1_cost = pl.CostEstimate(
        flops=2 * n_pad * n_pad * rhs1_w
        + (0 if use_z1 else 2 * n_pad * fin_p * hid_p)
        + 2 * n_pad * hid_p * c_p,
        transcendentals=0,
        bytes_accessed=2 * n_pad * n_pad
        + 2 * n_pad * rhs1_w * rhs1_fetches
        + 2 * hid_p * c_p + (0 if use_z1 else 2 * fin_p * hid_p)
        + 2 * n_pad * c_p,
    )

    if use_z1:
        kern1 = functools.partial(_layer1_z1_kernel, tk=tk, rhs_resident=rhs1_resident)
        in_specs1 = [
            pl.BlockSpec((tm, tk), lambda i, k: (i, k)),       # A tile
            rhs1_spec,                                          # z1 (resident or K-tiled)
            pl.BlockSpec((1, hid_p), lambda i, k: (0, 0)),     # b1 resident
            pl.BlockSpec((hid_p, c_p), lambda i, k: (0, 0)),   # W2 resident
        ]
        args1 = (a_p, rhs1, b1_p, w2_p)
    else:
        kern1 = functools.partial(_layer1_x_kernel, tk=tk, rhs_resident=rhs1_resident)
        in_specs1 = [
            pl.BlockSpec((tm, tk), lambda i, k: (i, k)),       # A tile
            rhs1_spec,                                          # X (resident or K-tiled)
            pl.BlockSpec((fin_p, hid_p), lambda i, k: (0, 0)),  # W1 resident
            pl.BlockSpec((1, hid_p), lambda i, k: (0, 0)),     # b1 resident
            pl.BlockSpec((hid_p, c_p), lambda i, k: (0, 0)),   # W2 resident
        ]
        args1 = (a_p, rhs1, w1_p, b1_p, w2_p)

    z2_p = pl.pallas_call(
        kern1,
        out_shape=jax.ShapeDtypeStruct((n_pad, c_p), jnp.bfloat16),
        grid_spec=pltpu.PrefetchScalarGridSpec(
            num_scalar_prefetch=0,
            grid=grid,
            in_specs=in_specs1,
            out_specs=pl.BlockSpec((tm, c_p), lambda i, k: (i, 0)),
            scratch_shapes=[pltpu.VMEM((tm, acc1_w), jnp.float32)],
        ),
        compiler_params=cparams(l1_vmem),
        cost_estimate=l1_cost,
    )(*args1)

    # ---------------- layer 2: aggregate + bias + masked log-softmax ----------------
    z2_spec = (pl.BlockSpec((n_pad, c_p), lambda i, k: (0, 0)) if z2_resident
               else pl.BlockSpec((tk, c_p), lambda i, k: (k, 0)))
    z2_blk_bytes = (n_pad if z2_resident else tk) * c_p * 2
    l2_vmem = (2 * tm * tk * 2 + 2 * z2_blk_bytes + 2 * c_p * 4
               + 2 * tm * c_p * 4 + tm * c_p * 4)
    z2_fetches = 1 if z2_resident else (n_pad // tm)
    l2_cost = pl.CostEstimate(
        flops=2 * n_pad * n_pad * c_p,
        transcendentals=n_pad * c_p + n_pad,
        bytes_accessed=2 * n_pad * n_pad + 2 * n_pad * c_p * z2_fetches + 4 * n_pad * c_p,
    )

    out_p = pl.pallas_call(
        functools.partial(_layer2_kernel, tk=tk, rhs_resident=z2_resident, valid_cols=out_c),
        out_shape=jax.ShapeDtypeStruct((n_pad, c_p), jnp.float32),
        grid_spec=pltpu.PrefetchScalarGridSpec(
            num_scalar_prefetch=0,
            grid=grid,
            in_specs=[
                pl.BlockSpec((tm, tk), lambda i, k: (i, k)),   # A tile
                z2_spec,                                        # z2 (resident or K-tiled)
                pl.BlockSpec((1, c_p), lambda i, k: (0, 0)),   # b2 resident
            ],
            out_specs=pl.BlockSpec((tm, c_p), lambda i, k: (i, 0)),
            scratch_shapes=[pltpu.VMEM((tm, c_p), jnp.float32)],
        ),
        compiler_params=cparams(l2_vmem),
        cost_estimate=l2_cost,
    )(a_p, z2_p, b2_p)

    return out_p[:n, :out_c]


def normalize_adj(adj):
    """Matches GraphConvolutionBlock.__init__: fill diagonal with 1, then D^-1/2 A D^-1/2."""
    n = adj.shape[0]
    eye = jnp.eye(n, dtype=adj.dtype)
    adj = adj * (1.0 - eye) + eye
    d_inv_sqrt = 1.0 / jnp.sqrt(jnp.sum(adj, axis=1))
    return d_inv_sqrt[:, None] * adj * d_inv_sqrt[None, :]


def _reference(x, adj_norm, w1, b1, w2, b2):
    z1 = x @ w1
    h = jnp.maximum(adj_norm @ z1 + b1, 0.0)
    z2 = h @ w2
    logits = adj_norm @ z2 + b2
    return jax.nn.log_softmax(logits, axis=1)


if __name__ == "__main__":
    key = jax.random.PRNGKey(0)

    # (name, N nodes, in_channels, hidden_dim, out_channels)
    cases = [
        ("fused_small", 16, 8, 32, 4),    # spec-scale demo -> single fused block
        ("tiled_z1", 300, 40, 16, 7),     # tiled path, z1-precompute reassociation
        ("tiled_x", 260, 8, 200, 6),      # tiled path, in-kernel W1 (fin_p < hid_p)
    ]

    for name, N, in_channels, hidden_dim, out_channels in cases:
        key, k_x, k_adj, k_w1, k_b1, k_w2, k_b2 = jax.random.split(key, 7)

        x = jax.random.normal(k_x, (N, in_channels), dtype=jnp.float32)
        adj_raw = (jax.random.uniform(k_adj, (N, N)) > 0.7).astype(jnp.float32)
        adj_raw = jnp.maximum(adj_raw, adj_raw.T)          # symmetric graph
        adj_norm = normalize_adj(adj_raw)

        lam1 = 1.0 / np.sqrt(hidden_dim)
        w1 = jax.random.uniform(k_w1, (in_channels, hidden_dim), jnp.float32, -lam1, lam1)
        b1 = jax.random.uniform(k_b1, (hidden_dim,), jnp.float32, -lam1, lam1)

        lam2 = 1.0 / np.sqrt(out_channels)
        w2 = jax.random.uniform(k_w2, (hidden_dim, out_channels), jnp.float32, -lam2, lam2)
        b2 = jax.random.uniform(k_b2, (out_channels,), jnp.float32, -lam2, lam2)

        out = jax.block_until_ready(gcn_forward(x, adj_norm, w1, b1, w2, b2))
        ref = _reference(x, adj_norm, w1, b1, w2, b2)

        # bf16 adjacency/activations in the kernel -> loosened tolerance vs f32 ref.
        np.testing.assert_allclose(np.asarray(out), np.asarray(ref),
                                   rtol=6e-2, atol=6e-2, err_msg=name)

    print("KERNEL_OK")
</pallas_src>

<mosaic_0001>
module attributes {stable_mosaic.version = 11 : i64} {
  func.func @_fused_small_kernel(%arg0: memref<128x128xbf16, #tpu.memory_space<vmem>>, %arg1: memref<128x128xbf16, #tpu.memory_space<vmem>>, %arg2: memref<1x128xf32, #tpu.memory_space<vmem>>, %arg3: memref<128x128xbf16, #tpu.memory_space<vmem>>, %arg4: memref<1x128xf32, #tpu.memory_space<vmem>>, %arg5: memref<128x128xf32, #tpu.memory_space<vmem>>) attributes {dimension_semantics = [], scalar_prefetch = 0 : i64, scratch_operands = 0 : i64, tpu.core_type = #tpu.core_type<tc>} {
    %c0 = arith.constant 0 : index
    %c0_0 = arith.constant 0 : index
    %0 = vector.load %arg0[%c0, %c0_0] : memref<128x128xbf16, #tpu.memory_space<vmem>>, vector<128x128xbf16>
    %c0_1 = arith.constant 0 : index
    %c0_2 = arith.constant 0 : index
    %1 = vector.load %arg1[%c0_1, %c0_2] : memref<128x128xbf16, #tpu.memory_space<vmem>>, vector<128x128xbf16>
    %cst = arith.constant dense<0.000000e+00> : vector<128x128xf32>
    %2 = tpu.matmul %0, %1, %cst {dimension_numbers = #tpu.dot_dimension_numbers<[1], [0], [0], [1], [0, 0, 1, 1], [], []>} : vector<128x128xbf16>, vector<128x128xbf16>, vector<128x128xf32> -> vector<128x128xf32>
    %c0_3 = arith.constant 0 : index
    %c0_4 = arith.constant 0 : index
    %3 = vector.load %arg2[%c0_3, %c0_4] : memref<1x128xf32, #tpu.memory_space<vmem>>, vector<1x128xf32>
    %4 = vector.broadcast %3 : vector<1x128xf32> to vector<128x128xf32>
    %5 = arith.addf %2, %4 : vector<128x128xf32>
    %cst_5 = arith.constant 0.000000e+00 : f32
    %6 = vector.broadcast %cst_5 : f32 to vector<128x128xf32>
    %7 = arith.maximumf %5, %6 : vector<128x128xf32>
    %8 = arith.truncf %7 : vector<128x128xf32> to vector<128x128xbf16>
    %c0_6 = arith.constant 0 : index
    %c0_7 = arith.constant 0 : index
    %9 = vector.load %arg3[%c0_6, %c0_7] : memref<128x128xbf16, #tpu.memory_space<vmem>>, vector<128x128xbf16>
    %cst_8 = arith.constant dense<0.000000e+00> : vector<128x128xf32>
    %10 = tpu.matmul %8, %9, %cst_8 {dimension_numbers = #tpu.dot_dimension_numbers<[1], [0], [0], [1], [0, 0, 1, 1], [], []>} : vector<128x128xbf16>, vector<128x128xbf16>, vector<128x128xf32> -> vector<128x128xf32>
    %11 = arith.truncf %10 : vector<128x128xf32> to vector<128x128xbf16>
    %cst_9 = arith.constant dense<0.000000e+00> : vector<128x128xf32>
    %12 = tpu.matmul %0, %11, %cst_9 {dimension_numbers = #tpu.dot_dimension_numbers<[1], [0], [0], [1], [0, 0, 1, 1], [], []>} : vector<128x128xbf16>, vector<128x128xbf16>, vector<128x128xf32> -> vector<128x128xf32>
    %c0_10 = arith.constant 0 : index
    %c0_11 = arith.constant 0 : index
    %13 = vector.load %arg4[%c0_10, %c0_11] : memref<1x128xf32, #tpu.memory_space<vmem>>, vector<1x128xf32>
    %14 = vector.broadcast %13 : vector<1x128xf32> to vector<128x128xf32>
    %15 = arith.addf %12, %14 : vector<128x128xf32>
    %16 = tpu.iota {dimensions = array<i32: 1>} : vector<128x128xi32>
    %c4_i32 = arith.constant 4 : i32
    %17 = vector.broadcast %c4_i32 : i32 to vector<128x128xi32>
    %18 = arith.cmpi slt, %16, %17 : vector<128x128xi32>
    %cst_12 = arith.constant -1.000000e+30 : f32
    %19 = vector.broadcast %cst_12 : f32 to vector<128x128xf32>
    %20 = arith.select %18, %15, %19 : vector<128x128xi1>, vector<128x128xf32>
    %cst_13 = arith.constant dense<0xFF800000> : vector<128xf32>
    %21 = vector.multi_reduction <maximumf>, %20, %cst_13 [1] : vector<128x128xf32> to vector<128xf32>
    %22 = vector.shape_cast %21 : vector<128xf32> to vector<128x1xf32>
    %23 = vector.broadcast %22 : vector<128x1xf32> to vector<128x128xf32>
    %24 = arith.subf %20, %23 : vector<128x128xf32>
    %25 = math.exp %24 : vector<128x128xf32>
    %cst_14 = arith.constant dense<0.000000e+00> : vector<128xf32>
    %26 = vector.multi_reduction <add>, %25, %cst_14 [1] : vector<128x128xf32> to vector<128xf32>
    %27 = vector.shape_cast %26 : vector<128xf32> to vector<128x1xf32>
    %28 = math.log %27 : vector<128x1xf32>
    %29 = vector.broadcast %28 : vector<128x1xf32> to vector<128x128xf32>
    %30 = arith.subf %24, %29 : vector<128x128xf32>
    %c0_15 = arith.constant 0 : index
    %c0_16 = arith.constant 0 : index
    %31 = vector.load %arg5[%c0_15, %c0_16] : memref<128x128xf32, #tpu.memory_space<vmem>>, vector<128x128xf32>
    tpu.vector_store %arg5[%c0_15, %c0_16], %30 {strides = array<i32>} : memref<128x128xf32, #tpu.memory_space<vmem>>, vector<128x128xf32>,
    return
  }
}

</mosaic_0001>

<bundles_post_ra>
// kernel: tpu_custom_call.1
= control target key start
LH: loop header
LB: loop body
LE: loop exit
PB: predicated region body
PF: predicated region fallthrough
CT: control target
= control target key end

     0   :  { %10 = vsyncpa [#allocation3], 0  ;;  %s1432_s0 = inlined_call_operand.hbm [shape: bf16[128,128], index: 0, kind: input, shape index: {}]   ;;  %s1433_s1 = inlined_call_operand.hbm [shape: bf16[128,128], index: 1, kind: input, shape index: {}]   ;;  %s1434_s2 = inlined_call_operand.vmem [shape: f32[1,128], index: 2, kind: input, shape index: {}]   ;;  %s1435_s3 = inlined_call_operand.hbm [shape: bf16[128,128], index: 3, kind: input, shape index: {}]   ;;  %s1436_s4 = inlined_call_operand.vmem [shape: f32[1,128], index: 4, kind: input, shape index: {}]   ;;  %s1437_s5 = inlined_call_operand.hbm [shape: f32[128,128], index: 5, kind: output, shape index: {}]  }
   0x1   :  { %11 = vsyncpa [#allocation6], 0 }
   0x2   :  { %12 = vsyncpa [#allocation4], 0  ;;  %s1181_s18 = smov [#allocation5]   ;;  %s1182_s20 = smov [#allocation2]  }
   0x3   :  { %s30_s19 = sshll.u32 %s1181_s18, 4  ;;  %s18_s21 = sshll.u32 %s1182_s20, 4  ;;  %s31_s19 = int_to_ptr.vmem [resolvable:$true] %s30_s19  ;;  %s1219_s21 = int_to_ptr.vmem [resolvable:$true] %s18_s21 }
   0x4   :  { %s1087_s24 = scalar_lea.hbm %s1433_s1, 1024 }
   0x5   :  { %p1088_p0 = scmp.ne.s32.totalorder %s1433_s1, %s1087_s24  ;;  %p1091_p1 = scmp.lt.u32.totalorder %s1087_s24, %s1433_s1 }
   0x7   :  { %p1093_p2 = pnand %p1091_p1, %p1088_p0 }
   0x9   :  { %1096 = shalt.err (!%p1093_p2)
}
   0xa   :  { %s1097_s29 = scalar_lea.vmem %s31_s19, 1024  ;;  %p1102_p4 = scmp.lt.s32.totalorder %s31_s19, %s31_s19 }
   0xb   :  { %p1098_p3 = scmp.ne.s32.totalorder %s31_s19, %s1097_s29  ;;  %p1103_p5 = scmp.lt.s32.totalorder %s1097_s29, %s1097_s29 }
   0xd   :  { %p1104_p6 = por %p1103_p5, %p1102_p4 }
   0xf   :  { %p1105_p7 = pnand %p1104_p6, %p1098_p3 }
  0x11   :  { %1108 = shalt.err (!%p1105_p7)
}
  0x12   :  { %s1183_s30 = smov 64   ;;  %s1184_s6 = smov 4  }
  0x13   :  { %36 = dma.hbm_to_vmem [thread:$0]  %s1433_s1, 1024, %s31_s19, [#allocation6], %s1183_s30, %s1183_s30, %s1184_s6  }
  0x14   :  { %s1109_s11 = scalar_lea.hbm %s1432_s0, 1024 }
  0x15   :  { %p1110_p8 = scmp.ne.s32.totalorder %s1432_s0, %s1109_s11  ;;  %p1113_p9 = scmp.lt.u32.totalorder %s1109_s11, %s1432_s0 }
  0x17   :  { %p1115_p10 = pnand %p1113_p9, %p1110_p8 }
  0x19   :  { %1118 = shalt.err (!%p1115_p10)
}
  0x1a   :  { %s1119_s16 = scalar_lea.vmem %s1219_s21, 1024  ;;  %p1124_p12 = scmp.lt.s32.totalorder %s1219_s21, %s1219_s21 }
  0x1b   :  { %p1120_p11 = scmp.ne.s32.totalorder %s1219_s21, %s1119_s16  ;;  %p1125_p13 = scmp.lt.s32.totalorder %s1119_s16, %s1119_s16 }
  0x1d   :  { %p1126_p0 = por %p1125_p13, %p1124_p12 }
  0x1f   :  { %p1127_p1 = pnand %p1126_p0, %p1120_p11 }
  0x21   :  { %1130 = shalt.err (!%p1127_p1)
}
  0x22   :  { %24 = dma.hbm_to_vmem [thread:$0]  %s1432_s0, 1024, %s1219_s21, [#allocation3], %s1183_s30, %s1183_s30, %s1184_s6  }
  0x23   :  { %s1185_s18 = smov [#allocation7]   ;;  %s1131_s23 = scalar_lea.hbm %s1435_s3, 1024 }
  0x24   :  { %s44_s19 = sshll.u32 %s1185_s18, 4  ;;  %p1132_p2 = scmp.ne.s32.totalorder %s1435_s3, %s1131_s23  ;;  %s45_s19 = int_to_ptr.vmem [resolvable:$true] %s44_s19 }
  0x25   :  { %p1135_p3 = scmp.lt.u32.totalorder %s1131_s23, %s1435_s3 }
  0x27   :  { %p1137_p4 = pnand %p1135_p3, %p1132_p2 }
  0x29   :  { %1140 = shalt.err (!%p1137_p4)
}
  0x2a   :  { %s1141_s28 = scalar_lea.vmem %s45_s19, 1024  ;;  %p1146_p6 = scmp.lt.s32.totalorder %s45_s19, %s45_s19 }
  0x2b   :  { %p1142_p5 = scmp.ne.s32.totalorder %s45_s19, %s1141_s28  ;;  %p1147_p7 = scmp.lt.s32.totalorder %s1141_s28, %s1141_s28 }
  0x2d   :  { %p1148_p8 = por %p1147_p7, %p1146_p6 }
  0x2f   :  { %p1149_p9 = pnand %p1148_p8, %p1142_p5 }
  0x31   :  { %1152 = shalt.err (!%p1149_p9)
}
  0x32   :  { %50 = dma.hbm_to_vmem [thread:$0]  %s1435_s3, 1024, %s45_s19, [#allocation6], %s1183_s30, %s1183_s30, %s1184_s6  }
  0x33   :  { %1175 = dma.done.wait [#allocation3], 1024  }
  0x34   :  { %1176 = vsyncadd [#allocation3], 4294966272 }
  0x35   :  { %1177 = dma.done.wait [#allocation6], 2048  }
  0x36   :  { %1178 = vsyncadd [#allocation6], 4294965248  ;;  %v999_v0 = vld [vmem:[#allocation5] sm:$0xff]   ;;  %v1000_v1 = vld [vmem:[#allocation5 + $0x8] sm:$0xff]  }
  0x37   :  { %879 = vmatprep.subr.bf16.mxu0 %v999_v0  ;;  %v1001_v2 = vld [vmem:[#allocation5 + $0x10] sm:$0xff]   ;;  %v1002_v3 = vld [vmem:[#allocation5 + $0x18] sm:$0xff]   ;;  %v1007_v4 = vld [vmem:[#allocation2] sm:$0xff]  }
  0x38   :  { %880 = vmatpush3.bf16.msra.mxu0 %v999_v0  ;;  %895 = vmatprep.mubr.bf16.mxu0 %v1007_v4  ;;  %v1003_v5 = vld [vmem:[#allocation5 + $0x20] sm:$0xff]   ;;  %v1004_v6 = vld [vmem:[#allocation5 + $0x28] sm:$0xff]   ;;  %v1005_v9 = vld [vmem:[#allocation5 + $0x30] sm:$0xff]  }
  0x39   :  { %881 = vmatprep.subr.bf16.mxu0 %v1000_v1  ;;  %v1015_v7 = vld [vmem:[#allocation7] sm:$0xff]   ;;  %v1016_v8 = vld [vmem:[#allocation7 + $0x8] sm:$0xff]   ;;  %v1017_v10 = vld [vmem:[#allocation7 + $0x10] sm:$0xff]  }
  0x3a   :  { %911 = vmatprep.subr.bf16.mxu1 %v1015_v7  ;;  %v1006_v11 = vld [vmem:[#allocation5 + $0x38] sm:$0xff]   ;;  %v1019_v13 = vld [vmem:[#allocation7 + $0x20] sm:$0xff]   ;;  %v1271_v14 = vld [vmem:[#allocation2 + $0x8] sm:$0xff]  }
  0x3b   :  { %912 = vmatpush3.bf16.msra.mxu1 %v1015_v7  ;;  %v1018_v12 = vld [vmem:[#allocation7 + $0x18] sm:$0xff]   ;;  %v1273_v15 = vld [vmem:[#allocation2 + $0x10] sm:$0xff]   ;;  %v1020_v16 = vld [vmem:[#allocation7 + $0x28] sm:$0xff]  }
  0x3c   :  { %882 = vmatpush3.bf16.msra.mxu0 %v1000_v1  ;;  %913 = vmatprep.subr.bf16.mxu1 %v1016_v8  ;;  %v1277_v17 = vld [vmem:[#allocation2 + $0x18] sm:$0xff]   ;;  %v1279_v18 = vld [vmem:[#allocation2 + $0x20] sm:$0xff]   ;;  %v1283_v19 = vld [vmem:[#allocation2 + $0x28] sm:$0xff]  }
  0x3d   :  { %883 = vmatprep.subr.bf16.mxu0 %v1001_v2  ;;  %v1285_v20 = vld [vmem:[#allocation2 + $0x30] sm:$0xff]   ;;  %v1289_v21 = vld [vmem:[#allocation2 + $0x38] sm:$0xff]   ;;  %v805_v24 = vld [vmem:[%s1434_s2] ss:$0 sm:$0xff] }
  0x3e   :  { %v1021_v22 = vld [vmem:[#allocation7 + $0x30] sm:$0xff]   ;;  %v1022_v23 = vld [vmem:[#allocation7 + $0x38] sm:$0xff]  }
  0x3f   :  { %914 = vmatpush3.bf16.msra.mxu1 %v1016_v8 }
  0x40   :  { %884 = vmatpush3.bf16.msra.mxu0 %v1001_v2  ;;  %915 = vmatprep.subr.bf16.mxu1 %v1017_v10 }
  0x41   :  { %885 = vmatprep.subr.bf16.mxu0 %v1002_v3 }
  0x43   :  { %916 = vmatpush3.bf16.msra.mxu1 %v1017_v10 }
  0x44   :  { %886 = vmatpush3.bf16.msra.mxu0 %v1002_v3  ;;  %917 = vmatprep.subr.bf16.mxu1 %v1018_v12 }
  0x45   :  { %887 = vmatprep.subr.bf16.mxu0 %v1003_v5 }
  0x47   :  { %918 = vmatpush3.bf16.msra.mxu1 %v1018_v12 }
  0x48   :  { %888 = vmatpush3.bf16.msra.mxu0 %v1003_v5  ;;  %919 = vmatprep.subr.bf16.mxu1 %v1019_v13 }
  0x49   :  { %889 = vmatprep.subr.bf16.mxu0 %v1004_v6 }
  0x4b   :  { %920 = vmatpush3.bf16.msra.mxu1 %v1019_v13 }
  0x4c   :  { %890 = vmatpush3.bf16.msra.mxu0 %v1004_v6  ;;  %921 = vmatprep.subr.bf16.mxu1 %v1020_v16 }
  0x4d   :  { %891 = vmatprep.subr.bf16.mxu0 %v1005_v9 }
  0x4f   :  { %922 = vmatpush3.bf16.msra.mxu1 %v1020_v16 }
  0x50   :  { %892 = vmatpush3.bf16.msra.mxu0 %v1005_v9  ;;  %923 = vmatprep.subr.bf16.mxu1 %v1021_v22 }
  0x51   :  { %893 = vmatprep.subr.bf16.mxu0 %v1006_v11 }
  0x53   :  { %924 = vmatpush3.bf16.msra.mxu1 %v1021_v22 }
  0x54   :  { %894 = vmatpush3.bf16.msra.mxu0 %v1006_v11  ;;  %925 = vmatprep.subr.bf16.mxu1 %v1022_v23 }
  0x57   :  { %896 = vmatmul.mubr.bf16.vlgmr.msra.gmra.mrb[0].mxu0 %v1271_v14  ;;  %926 = vmatpush3.bf16.msra.mxu1 %v1022_v23 }
  0x58   :  { %899 = vmatprep.mubr.bf16.mxu0 %v1273_v15 }
  0x5f   :  { %900 = vmatmul.mubr.bf16.gmra.mrb[4].mxu0 %v1277_v17 }
  0x60   :  { %903 = vmatprep.mubr.bf16.mxu0 %v1279_v18 }
  0x67   :  { %904 = vmatmul.mubr.bf16.gmra.mrb[8].mxu0 %v1283_v19 }
  0x68   :  { %907 = vmatprep.mubr.bf16.mxu0 %v1285_v20 }
  0x6f   :  { %908 = vmatmul.mubr.bf16.gmra.mrb[12].mxu0 %v1289_v21 }
  0x70   :  { %959 = vmatprep.mubr.bf16.mxu0 %v1007_v4 }
 0x12a   :  { %v897_v25 = vpop.f32.mrb[0].mxu0 }
 0x12b   :  { %v241_v26 = vadd.f32 %v897_v25, %v805_v24  ;;  %v232_v27 = vpop.f32.mrb[1].mxu0 }
 0x12c   :  { %v233_v28 = vadd.f32 %v805_v24, %v232_v27  ;;  %v898_v29 = vpop.f32.mrb[2].mxu0 }
 0x12d   :  { %v244_v30 = vadd.f32 %v898_v29, %v805_v24  ;;  %v235_v31 = vpop.f32.mrb[3].mxu0  ;;  %v297_v33 = vmax.f32 %v241_v26, 0.0 }
 0x12e   :  { %v236_v32 = vadd.f32 %v805_v24, %v235_v31  ;;  %v295_v35 = vmax.f32 %v233_v28, 0.0 }
 0x12f   :  { %v298_v34 = vmax.f32 %v244_v30, 0.0 }
 0x130   :  { %v296_v36 = vmax.f32 %v236_v32, 0.0 }
 0x131   :  { %v312_v37 = vpack.c.bf16 %v298_v34, %v297_v33 }
 0x132   :  { %v901_v38 = vpop.f32.mrb[4].mxu0  ;;  %v311_v39 = vpack.c.bf16 %v296_v36, %v295_v35 }
 0x133   :  { %v257_v40 = vadd.f32 %v901_v38, %v805_v24  ;;  %v248_v41 = vpop.f32.mrb[5].mxu0 }
 0x134   :  { %v249_v42 = vadd.f32 %v805_v24, %v248_v41  ;;  %v902_v43 = vpop.f32.mrb[6].mxu0  ;;  %927 = vmatprep.mubr.bf16.mxu1 %v311_v39 }
 0x135   :  { %v260_v44 = vadd.f32 %v902_v43, %v805_v24  ;;  %v251_v45 = vpop.f32.mrb[7].mxu0  ;;  %928 = vmatmul.mubr.bf16.vlgmr.msra.gmra.mrb[0].mxu1 %v312_v37  ;;  %v301_v47 = vmax.f32 %v257_v40, 0.0 }
 0x136   :  { %v252_v46 = vadd.f32 %v805_v24, %v251_v45  ;;  %v299_v49 = vmax.f32 %v249_v42, 0.0 }
 0x137   :  { %v302_v48 = vmax.f32 %v260_v44, 0.0 }
 0x138   :  { %v300_v50 = vmax.f32 %v252_v46, 0.0 }
 0x139   :  { %v314_v51 = vpack.c.bf16 %v302_v48, %v301_v47  ;;  %v592_v47 = vlaneseq }
 0x13a   :  { %v313_v52 = vpack.c.bf16 %v300_v50, %v299_v49  ;;  %v905_v53 = vpop.f32.mrb[8].mxu0  ;;  %v830_v49 = vld [vmem:[%s1436_s4] ss:$0 sm:$0xff]  ;;  %s1186_s4 = smov [#allocation8]  }
 0x13b   :  { %v273_v54 = vadd.f32 %v905_v53, %v805_v24  ;;  %v264_v55 = vpop.f32.mrb[9].mxu0  ;;  %v1302_v48 = vand.u32 127, %v592_v47  ;;  %s792_s6 = sshll.u32 %s1186_s4, 4  ;;  %s793_s6 = int_to_ptr.vmem [resolvable:$true] %s792_s6 }
 0x13c   :  { %v265_v56 = vadd.f32 %v805_v24, %v264_v55  ;;  %v906_v57 = vpop.f32.mrb[10].mxu0  ;;  %931 = vmatprep.mubr.bf16.mxu1 %v313_v52  ;;  %s1153_s7 = scalar_lea.vmem %s793_s6, 2048  ;;  %p1158_p11 = scmp.lt.s32.totalorder %s793_s6, %s793_s6 }
 0x13d   :  { %v276_v58 = vadd.f32 %v906_v57, %v805_v24  ;;  %v267_v59 = vpop.f32.mrb[11].mxu0  ;;  %932 = vmatmul.mubr.bf16.gmra.mrb[4].mxu1 %v314_v51  ;;  %v305_v61 = vmax.f32 %v273_v54, 0.0  ;;  %vm594_vm0 = vcmp.lt.s32.totalorder %v1302_v48, 4  ;;  %p1154_p10 = scmp.ne.s32.totalorder %s793_s6, %s1153_s7  ;;  %p1159_p12 = scmp.lt.s32.totalorder %s1153_s7, %s1153_s7 }
 0x13e   :  { %v268_v60 = vadd.f32 %v805_v24, %v267_v59  ;;  %v303_v63 = vmax.f32 %v265_v56, 0.0 }
 0x13f   :  { %v306_v62 = vmax.f32 %v276_v58, 0.0  ;;  %p1160_p13 = por %p1159_p12, %p1158_p11 }
 0x140   :  { %v304_v0 = vmax.f32 %v268_v60, 0.0 }
 0x141   :  { %v316_v1 = vpack.c.bf16 %v306_v62, %v305_v61  ;;  %p1161_p0 = pnand %p1160_p13, %p1154_p10 }
 0x142   :  { %v315_v2 = vpack.c.bf16 %v304_v0, %v303_v63  ;;  %v909_v3 = vpop.f32.mrb[12].mxu0 }
 0x143   :  { %v289_v4 = vadd.f32 %v909_v3, %v805_v24  ;;  %v280_v5 = vpop.f32.mrb[13].mxu0 }
 0x144   :  { %v281_v6 = vadd.f32 %v805_v24, %v280_v5  ;;  %v910_v7 = vpop.f32.mrb[14].mxu0  ;;  %935 = vmatprep.mubr.bf16.mxu1 %v315_v2 }
 0x145   :  { %v292_v8 = vadd.f32 %v910_v7, %v805_v24  ;;  %v283_v9 = vpop.f32.mrb[15].mxu0  ;;  %936 = vmatmul.mubr.bf16.gmra.mrb[8].mxu1 %v316_v1  ;;  %v309_v11 = vmax.f32 %v289_v4, 0.0 }
 0x146   :  { %v284_v10 = vadd.f32 %v805_v24, %v283_v9  ;;  %v307_v13 = vmax.f32 %v281_v6, 0.0 }
 0x147   :  { %v310_v12 = vmax.f32 %v292_v8, 0.0 }
 0x148   :  { %v308_v16 = vmax.f32 %v284_v10, 0.0 }
 0x149   :  { %v318_v22 = vpack.c.bf16 %v310_v12, %v309_v11 }
 0x14a   :  { %v317_v23 = vpack.c.bf16 %v308_v16, %v307_v13 }
 0x14c   :  { %939 = vmatprep.mubr.bf16.mxu1 %v317_v23 }
 0x14d   :  { %940 = vmatmul.mubr.bf16.gmra.mrb[12].mxu1 %v318_v22 }
 0x14e   :  { %967 = vmatprep.mubr.bf16.mxu1 %v1279_v18 }
 0x208   :  { %v929_v25 = vpop.f32.mrb[0].mxu1 }
 0x209   :  { %v417_v26 = vpop.f32.mrb[1].mxu1 }
 0x20a   :  { %v930_v27 = vpop.f32.mrb[2].mxu1 }
 0x20b   :  { %v481_v28 = vpack.c.bf16 %v930_v27, %v929_v25  ;;  %v420_v29 = vpop.f32.mrb[3].mxu1 }
 0x20c   :  { %v480_v30 = vpack.c.bf16 %v420_v29, %v417_v26 }
 0x20e   :  { %943 = vmatprep.subr.bf16.mxu0 %v480_v30  ;;  %975 = vmatprep.subr.bf16.mxu1 %v480_v30 }
 0x20f   :  { %944 = vmatpush3.bf16.msra.mxu0 %v480_v30  ;;  %983 = vmatpush3.bf16.msra.mxu1 %v480_v30 }
 0x210   :  { %v933_v24 = vpop.f32.mrb[4].mxu1  ;;  %945 = vmatprep.subr.bf16.mxu0 %v481_v28  ;;  %976 = vmatprep.subr.bf16.mxu1 %v481_v28 }
 0x211   :  { %v433_v31 = vpop.f32.mrb[5].mxu1 }
 0x212   :  { %v934_v32 = vpop.f32.mrb[6].mxu1 }
 0x213   :  { %v483_v33 = vpack.c.bf16 %v934_v32, %v933_v24  ;;  %v436_v34 = vpop.f32.mrb[7].mxu1  ;;  %946 = vmatpush3.bf16.msra.mxu0 %v481_v28  ;;  %984 = vmatpush3.bf16.msra.mxu1 %v481_v28 }
 0x214   :  { %v482_v18 = vpack.c.bf16 %v436_v34, %v433_v31 }
 0x216   :  { %947 = vmatprep.subr.bf16.mxu0 %v482_v18  ;;  %977 = vmatprep.subr.bf16.mxu1 %v482_v18 }
 0x217   :  { %948 = vmatpush3.bf16.msra.mxu0 %v482_v18  ;;  %985 = vmatpush3.bf16.msra.mxu1 %v482_v18 }
 0x218   :  { %v937_v35 = vpop.f32.mrb[8].mxu1  ;;  %949 = vmatprep.subr.bf16.mxu0 %v483_v33  ;;  %978 = vmatprep.subr.bf16.mxu1 %v483_v33 }
 0x219   :  { %v449_v36 = vpop.f32.mrb[9].mxu1 }
 0x21a   :  { %v938_v37 = vpop.f32.mrb[10].mxu1 }
 0x21b   :  { %v485_v38 = vpack.c.bf16 %v938_v37, %v937_v35  ;;  %v452_v39 = vpop.f32.mrb[11].mxu1  ;;  %950 = vmatpush3.bf16.msra.mxu0 %v483_v33  ;;  %986 = vmatpush3.bf16.msra.mxu1 %v483_v33 }
 0x21c   :  { %v484_v40 = vpack.c.bf16 %v452_v39, %v449_v36 }
 0x21e   :  { %951 = vmatprep.subr.bf16.mxu0 %v484_v40  ;;  %979 = vmatprep.subr.bf16.mxu1 %v484_v40 }
 0x21f   :  { %952 = vmatpush3.bf16.msra.mxu0 %v484_v40  ;;  %987 = vmatpush3.bf16.msra.mxu1 %v484_v40 }
 0x220   :  { %v941_v41 = vpop.f32.mrb[12].mxu1  ;;  %953 = vmatprep.subr.bf16.mxu0 %v485_v38  ;;  %980 = vmatprep.subr.bf16.mxu1 %v485_v38 }
 0x221   :  { %v465_v42 = vpop.f32.mrb[13].mxu1 }
 0x222   :  { %v942_v43 = vpop.f32.mrb[14].mxu1 }
 0x223   :  { %v487_v44 = vpack.c.bf16 %v942_v43, %v941_v41  ;;  %v468_v45 = vpop.f32.mrb[15].mxu1  ;;  %954 = vmatpush3.bf16.msra.mxu0 %v485_v38  ;;  %988 = vmatpush3.bf16.msra.mxu1 %v485_v38 }
 0x224   :  { %v486_v46 = vpack.c.bf16 %v468_v45, %v465_v42 }
 0x226   :  { %955 = vmatprep.subr.bf16.mxu0 %v486_v46  ;;  %981 = vmatprep.subr.bf16.mxu1 %v486_v46 }
 0x227   :  { %956 = vmatpush3.bf16.msra.mxu0 %v486_v46  ;;  %989 = vmatpush3.bf16.msra.mxu1 %v486_v46 }
 0x228   :  { %957 = vmatprep.subr.bf16.mxu0 %v487_v44  ;;  %982 = vmatprep.subr.bf16.mxu1 %v487_v44 }
 0x22b   :  { %958 = vmatpush3.bf16.msra.mxu0 %v487_v44  ;;  %990 = vmatpush3.bf16.msra.mxu1 %v487_v44 }
 0x22e   :  { %960 = vmatmul.mubr.bf16.vlgmr.msra.gmra.mrb[16].mxu0 %v1271_v14  ;;  %968 = vmatmul.mubr.bf16.vlgmr.msra.gmra.mrb[16].mxu1 %v1283_v19 }
 0x22f   :  { %963 = vmatprep.mubr.bf16.mxu0 %v1273_v15  ;;  %971 = vmatprep.mubr.bf16.mxu1 %v1285_v20 }
 0x236   :  { %964 = vmatmul.mubr.bf16.gmra.mrb[20].mxu0 %v1277_v17  ;;  %972 = vmatmul.mubr.bf16.gmra.mrb[20].mxu1 %v1289_v21 }
 0x301   :  { %v961_v50 = vpop.f32.mrb[16].mxu0  ;;  %v969_v51 = vpop.f32.mrb[16].mxu1 }
 0x302   :  { %v538_v14 = vadd.f32 %v961_v50, %v830_v49  ;;  %v570_v19 = vadd.f32 %v969_v51, %v830_v49  ;;  %v529_v15 = vpop.f32.mrb[17].mxu0  ;;  %v561_v52 = vpop.f32.mrb[17].mxu1 }
 0x303   :  { %v962_v20 = vpop.f32.mrb[18].mxu0  ;;  %v970_v53 = vpop.f32.mrb[18].mxu1  ;;  %v530_v17 = vadd.f32 %v830_v49, %v529_v15  ;;  %v562_v58 = vadd.f32 %v830_v49, %v561_v52 }
 0x304   :  { %v541_v54 = vadd.f32 %v962_v20, %v830_v49  ;;  %v532_v21 = vpop.f32.mrb[19].mxu0  ;;  %v564_v55 = vpop.f32.mrb[19].mxu1  ;;  %v605_v56 = vsel %vm594_vm0, %v570_v19, -1e+30  ;;  %v597_v57 = vsel %vm594_vm0, %v538_v14, -1e+30  ;;  %v573_v59 = vadd.f32 %v970_v53, %v830_v49 }
 0x305   :  { %631 = vmax.xlane.f32.xlu0 %v605_v56  ;;  %615 = vmax.xlane.f32.xlu1 %v597_v57  ;;  %v595_v61 = vsel %vm594_vm0, %v530_v17, -1e+30  ;;  %v533_v4 = vadd.f32 %v830_v49, %v532_v21  ;;  %v565_v5 = vadd.f32 %v830_v49, %v564_v55  ;;  %v603_v7 = vsel %vm594_vm0, %v562_v58, -1e+30 }
 0x306   :  { %v598_v60 = vsel %vm594_vm0, %v541_v54, -1e+30  ;;  %v606_v6 = vsel %vm594_vm0, %v573_v59, -1e+30 }
 0x307   :  { %v604_v12 = vsel %vm594_vm0, %v565_v5, -1e+30  ;;  %v596_v13 = vsel %vm594_vm0, %v533_v4, -1e+30 }
 0x309   :  { %617 = vmax.xlane.f32.xlu1 %v598_v60  ;;  %611 = vmax.xlane.f32.xlu0 %v595_v61  ;;  %v965_v62 = vpop.f32.mrb[20].mxu0  ;;  %v973_v63 = vpop.f32.mrb[20].mxu1 }
 0x30a   :  { %v545_v0 = vpop.f32.mrb[21].mxu0  ;;  %v577_v1 = vpop.f32.mrb[21].mxu1  ;;  %v554_v10 = vadd.f32 %v965_v62, %v830_v49  ;;  %v586_v31 = vadd.f32 %v973_v63, %v830_v49 }
 0x30b   :  { %v966_v2 = vpop.f32.mrb[22].mxu0  ;;  %v974_v3 = vpop.f32.mrb[22].mxu1  ;;  %v546_v23 = vadd.f32 %v830_v49, %v545_v0  ;;  %v578_v26 = vadd.f32 %v830_v49, %v577_v1 }
 0x30c   :  { %v548_v8 = vpop.f32.mrb[23].mxu0  ;;  %v580_v9 = vpop.f32.mrb[23].mxu1  ;;  %v557_v11 = vadd.f32 %v966_v2, %v830_v49  ;;  %v601_v22 = vsel %vm594_vm0, %v554_v10, -1e+30  ;;  %v589_v32 = vadd.f32 %v974_v3, %v830_v49  ;;  %v1348_v34 = vsel %vm594_vm0, %v586_v31, -1e+30 }
 0x30d   :  { %633 = vmax.xlane.f32.xlu1 %v606_v6  ;;  %627 = vmax.xlane.f32.xlu0 %v603_v7  ;;  %v549_v25 = vadd.f32 %v830_v49, %v548_v8  ;;  %v581_v27 = vadd.f32 %v830_v49, %v580_v9  ;;  %v599_v29 = vsel %vm594_vm0, %v546_v23, -1e+30  ;;  %v1338_v24 = vsel %vm594_vm0, %v578_v26, -1e+30 }
 0x30e   :  { %v602_v16 = vsel %vm594_vm0, %v557_v11, -1e+30  ;;  %v1344_v33 = vsel %vm594_vm0, %v589_v32, -1e+30 }
 0x30f   :  { %v600_v28 = vsel %vm594_vm0, %v549_v25, -1e+30  ;;  %v1334_v30 = vsel %vm594_vm0, %v581_v27, -1e+30 }
 0x311   :  { %629 = vmax.xlane.f32.xlu1 %v604_v12  ;;  %613 = vmax.xlane.f32.xlu0 %v596_v13 }
 0x315   :  { %625 = vmax.xlane.f32.xlu1 %v602_v16  ;;  %623 = vmax.xlane.f32.xlu0 %v601_v22 }
 0x319   :  { %621 = vmax.xlane.f32.xlu1 %v600_v28  ;;  %619 = vmax.xlane.f32.xlu0 %v599_v29 }
 0x31d   :  { %637 = vmax.xlane.f32.xlu1 %v1334_v30  ;;  %635 = vmax.xlane.f32.xlu0 %v1338_v24 }
 0x321   :  { %641 = vmax.xlane.f32.xlu1 %v1344_v33  ;;  %639 = vmax.xlane.f32.xlu0 %v1348_v34 }
 0x392   :  { %v632_v18 = vpop.xlane.xlu0 %631  ;;  %v616_v35 = vpop.xlane.xlu1 %615 }
 0x393   :  { %v1352_v36 = vsub.f32 %v597_v57, %v616_v35  ;;  %v1354_v37 = vsub.f32 %v605_v56, %v632_v18 }
 0x395   :  { %v663_v38 = vmul.f32 1.442695, %v1352_v36  ;;  %v679_v42 = vmul.f32 1.442695, %v1354_v37 }
 0x396   :  { %v618_v39 = vpop.xlane.xlu1 %617  ;;  %v612_v40 = vpop.xlane.xlu0 %611 }
 0x397   :  { %v1357_v41 = vsub.f32 %v598_v60, %v618_v39  ;;  %1023 = vpow2.f32 %v663_v38  ;;  %v1360_v43 = vsub.f32 %v595_v61, %v612_v40 }
 0x399   :  { %v665_v44 = vmul.f32 1.442695, %v1357_v41  ;;  %v659_v49 = vmul.f32 1.442695, %v1360_v43 }
 0x39a   :  { %v634_v45 = vpop.xlane.xlu1 %633  ;;  %v628_v46 = vpop.xlane.xlu0 %627 }
 0x39b   :  { %1025 = vpow2.f32 %v665_v44  ;;  %v1363_v47 = vsub.f32 %v606_v6, %v634_v45  ;;  %v1365_v48 = vsub.f32 %v603_v7, %v628_v46 }
 0x39c   :  { %1027 = vpow2.f32 %v679_v42 }
 0x39d   :  { %v681_v50 = vmul.f32 1.442695, %v1363_v47  ;;  %v675_v19 = vmul.f32 1.442695, %v1365_v48 }
 0x39e   :  { %v630_v51 = vpop.xlane.xlu1 %629  ;;  %v614_v14 = vpop.xlane.xlu0 %613 }
 0x39f   :  { %1029 = vpow2.f32 %v681_v50  ;;  %v1370_v15 = vsub.f32 %v604_v12, %v630_v51  ;;  %v1372_v52 = vsub.f32 %v596_v13, %v614_v14 }
 0x3a0   :  { %1031 = vpow2.f32 %v659_v49 }
 0x3a1   :  { %v661_v20 = vmul.f32 1.442695, %v1372_v52  ;;  %v1024_v53 = vpop.eup %1023  ;;  %1033 = vpow2.f32 %v675_v19  ;;  %v677_v21 = vmul.f32 1.442695, %v1370_v15 }
 0x3a2   :  { %v626_v17 = vpop.xlane.xlu1 %625  ;;  %v624_v54 = vpop.xlane.xlu0 %623  ;;  %695 = vadd.xlane.f32.xlu0 %v1024_v53 }
 0x3a3   :  { %v1376_v55 = vsub.f32 %v602_v16, %v626_v17  ;;  %v1378_v56 = vsub.f32 %v601_v22, %v624_v54  ;;  %1035 = vpow2.f32 %v661_v20 }
 0x3a4   :  { %1037 = vpow2.f32 %v677_v21 }
 0x3a5   :  { %v1026_v57 = vpop.eup %1025  ;;  %v671_v58 = vmul.f32 1.442695, %v1378_v56  ;;  %v673_v62 = vmul.f32 1.442695, %v1376_v55 }
 0x3a6   :  { %v1028_v59 = vpop.eup %1027  ;;  %697 = vadd.xlane.f32.xlu1 %v1026_v57  ;;  %v622_v60 = vpop.xlane.xlu1 %621 }
 0x3a7   :  { %v620_v61 = vpop.xlane.xlu0 %619  ;;  %v1382_v63 = vsub.f32 %v600_v28, %v622_v60  ;;  %711 = vadd.xlane.f32.xlu0 %v1028_v59  ;;  %1039 = vpow2.f32 %v671_v58 }
 0x3a8   :  { %v1384_v0 = vsub.f32 %v599_v29, %v620_v61  ;;  %1041 = vpow2.f32 %v673_v62 }
 0x3a9   :  { %v1030_v1 = vpop.eup %1029  ;;  %v669_v6 = vmul.f32 1.442695, %v1382_v63 }
 0x3aa   :  { %v667_v2 = vmul.f32 1.442695, %v1384_v0  ;;  %v1032_v3 = vpop.eup %1031  ;;  %713 = vadd.xlane.f32.xlu1 %v1030_v1  ;;  %v638_v4 = vpop.xlane.xlu1 %637 }
 0x3ab   :  { %v636_v5 = vpop.xlane.xlu0 %635  ;;  %v1389_v7 = vsub.f32 %v1334_v30, %v638_v4  ;;  %691 = vadd.xlane.f32.xlu0 %v1032_v3  ;;  %v1034_v9 = vpop.eup %1033 }
 0x3ac   :  { %v1392_v8 = vsub.f32 %v1338_v24, %v636_v5  ;;  %1043 = vpow2.f32 %v667_v2 }
 0x3ad   :  { %v1036_v11 = vpop.eup %1035  ;;  %1045 = vpow2.f32 %v669_v6  ;;  %v685_v16 = vmul.f32 1.442695, %v1389_v7 }
 0x3ae   :  { %v683_v10 = vmul.f32 1.442695, %v1392_v8  ;;  %v642_v12 = vpop.xlane.xlu1 %641  ;;  %693 = vadd.xlane.f32.xlu1 %v1036_v11  ;;  %v1038_v25 = vpop.eup %1037 }
 0x3af   :  { %v640_v13 = vpop.xlane.xlu0 %639  ;;  %707 = vadd.xlane.f32.xlu0 %v1034_v9  ;;  %v1400_v23 = vsub.f32 %v1344_v33, %v642_v12 }
 0x3b0   :  { %v1397_v22 = vsub.f32 %v1348_v34, %v640_v13  ;;  %1047 = vpow2.f32 %v683_v10 }
 0x3b1   :  { %v1040_v27 = vpop.eup %1039  ;;  %1049 = vpow2.f32 %v685_v16  ;;  %v689_v28 = vmul.f32 1.442695, %v1400_v23 }
 0x3b2   :  { %v687_v26 = vmul.f32 1.442695, %v1397_v22  ;;  %709 = vadd.xlane.f32.xlu1 %v1038_v25  ;;  %v1042_v29 = vpop.eup %1041 }
 0x3b3   :  { %703 = vadd.xlane.f32.xlu0 %v1040_v27 }
 0x3b4   :  { %1051 = vpow2.f32 %v687_v26 }
 0x3b5   :  { %1053 = vpow2.f32 %v689_v28 }
 0x3b6   :  { %v1044_v30 = vpop.eup %1043  ;;  %705 = vadd.xlane.f32.xlu1 %v1042_v29 }
 0x3b7   :  { %699 = vadd.xlane.f32.xlu0 %v1044_v30  ;;  %v1046_v24 = vpop.eup %1045 }
 0x3ba   :  { %v1048_v31 = vpop.eup %1047  ;;  %701 = vadd.xlane.f32.xlu1 %v1046_v24 }
 0x3bb   :  { %715 = vadd.xlane.f32.xlu0 %v1048_v31  ;;  %v1050_v32 = vpop.eup %1049 }
 0x3be   :  { %v1052_v33 = vpop.eup %1051  ;;  %717 = vadd.xlane.f32.xlu1 %v1050_v32 }
 0x3bf   :  { %719 = vadd.xlane.f32.xlu0 %v1052_v33  ;;  %v1054_v34 = vpop.eup %1053 }
 0x3c2   :  { %721 = vadd.xlane.f32.xlu1 %v1054_v34 }
 0x42f   :  { %v696_v18 = vpop.xlane.xlu0 %695 }
 0x430   :  { %1055 = vlog2.f32 %v696_v18 }
 0x433   :  { %v698_v35 = vpop.xlane.xlu1 %697 }
 0x434   :  { %1057 = vlog2.f32 %v698_v35  ;;  %v712_v38 = vpop.xlane.xlu0 %711 }
 0x435   :  { %1059 = vlog2.f32 %v712_v38 }
 0x437   :  { %v714_v39 = vpop.xlane.xlu1 %713 }
 0x438   :  { %1061 = vlog2.f32 %v714_v39  ;;  %v692_v40 = vpop.xlane.xlu0 %691 }
 0x439   :  { %1063 = vlog2.f32 %v692_v40 }
 0x43a   :  { %v1056_v42 = vpop.eup %1055 }
 0x43b   :  { %v728_v44 = vmul.f32 0.6931472, %v1056_v42  ;;  %v694_v45 = vpop.xlane.xlu1 %693 }
 0x43c   :  { %v708_v46 = vpop.xlane.xlu0 %707  ;;  %1065 = vlog2.f32 %v694_v45 }
 0x43d   :  { %v757_v50 = vsub.f32 %v1352_v36, %v728_v44  ;;  %1067 = vlog2.f32 %v708_v46 }
 0x43e   :  { %v1058_v49 = vpop.eup %1057 }
 0x43f   :  { %v1060_v51 = vpop.eup %1059  ;;  %v730_v14 = vmul.f32 0.6931472, %v1058_v49  ;;  %773 = vst [vmem:[#allocation8 + $0x10] sm:$0xff] %v757_v50  ;;  %v710_v20 = vpop.xlane.xlu1 %709 }
 0x440   :  { %v744_v19 = vmul.f32 0.6931472, %v1060_v51  ;;  %v704_v53 = vpop.xlane.xlu0 %703  ;;  %1069 = vlog2.f32 %v710_v20 }
 0x441   :  { %v758_v17 = vsub.f32 %v1357_v41, %v730_v14  ;;  %1071 = vlog2.f32 %v704_v53 }
 0x442   :  { %v1062_v54 = vpop.eup %1061  ;;  %v765_v21 = vsub.f32 %v1354_v37, %v744_v19 }
 0x443   :  { %v1064_v57 = vpop.eup %1063  ;;  %774 = vst [vmem:[#allocation8 + $0x18] sm:$0xff] %v758_v17  ;;  %v746_v58 = vmul.f32 0.6931472, %v1062_v54  ;;  %v706_v36 = vpop.xlane.xlu1 %705 }
 0x444   :  { %781 = vst [vmem:[#allocation8 + $0x50] sm:$0xff] %v765_v21  ;;  %v724_v59 = vmul.f32 0.6931472, %v1064_v57  ;;  %v700_v60 = vpop.xlane.xlu0 %699  ;;  %1073 = vlog2.f32 %v706_v36 }
 0x445   :  { %v766_v61 = vsub.f32 %v1363_v47, %v746_v58  ;;  %1075 = vlog2.f32 %v700_v60 }
 0x446   :  { %v755_v62 = vsub.f32 %v1360_v43, %v724_v59  ;;  %v1066_v1 = vpop.eup %1065 }
 0x447   :  { %782 = vst [vmem:[#allocation8 + $0x58] sm:$0xff] %v766_v61  ;;  %v1068_v41 = vpop.eup %1067  ;;  %v726_v2 = vmul.f32 0.6931472, %v1066_v1  ;;  %v702_v37 = vpop.xlane.xlu1 %701 }
 0x448   :  { %771 = vst [vmem:[#allocation8] sm:$0xff] %v755_v62  ;;  %v716_v3 = vpop.xlane.xlu0 %715  ;;  %v740_v4 = vmul.f32 0.6931472, %v1068_v41  ;;  %1077 = vlog2.f32 %v702_v37 }
 0x449   :  { %v756_v5 = vsub.f32 %v1372_v52, %v726_v2  ;;  %1079 = vlog2.f32 %v716_v3 }
 0x44a   :  { %v1070_v6 = vpop.eup %1069  ;;  %v763_v9 = vsub.f32 %v1365_v48, %v740_v4 }
 0x44b   :  { %v1072_v47 = vpop.eup %1071  ;;  %772 = vst [vmem:[#allocation8 + $0x8] sm:$0xff] %v756_v5  ;;  %v742_v10 = vmul.f32 0.6931472, %v1070_v6  ;;  %v718_v43 = vpop.xlane.xlu1 %717 }
 0x44c   :  { %v720_v11 = vpop.xlane.xlu0 %719  ;;  %779 = vst [vmem:[#allocation8 + $0x40] sm:$0xff] %v763_v9  ;;  %v736_v12 = vmul.f32 0.6931472, %v1072_v47  ;;  %1081 = vlog2.f32 %v718_v43 }
 0x44d   :  { %v764_v13 = vsub.f32 %v1370_v15, %v742_v10  ;;  %1083 = vlog2.f32 %v720_v11 }
 0x44e   :  { %v1074_v16 = vpop.eup %1073  ;;  %v761_v25 = vsub.f32 %v1378_v56, %v736_v12 }
 0x44f   :  { %v1076_v26 = vpop.eup %1075  ;;  %780 = vst [vmem:[#allocation8 + $0x48] sm:$0xff] %v764_v13  ;;  %v738_v52 = vmul.f32 0.6931472, %v1074_v16  ;;  %v722_v27 = vpop.xlane.xlu1 %721 }
 0x450   :  { %777 = vst [vmem:[#allocation8 + $0x30] sm:$0xff] %v761_v25  ;;  %v732_v48 = vmul.f32 0.6931472, %v1076_v26  ;;  %1085 = vlog2.f32 %v722_v27 }
 0x451   :  { %v762_v28 = vsub.f32 %v1376_v55, %v738_v52 }
 0x452   :  { %v1078_v29 = vpop.eup %1077  ;;  %v759_v30 = vsub.f32 %v1384_v0, %v732_v48 }
 0x453   :  { %v1080_v24 = vpop.eup %1079  ;;  %778 = vst [vmem:[#allocation8 + $0x38] sm:$0xff] %v762_v28  ;;  %v734_v31 = vmul.f32 0.6931472, %v1078_v29 }
 0x454   :  { %775 = vst [vmem:[#allocation8 + $0x20] sm:$0xff] %v759_v30  ;;  %v748_v15 = vmul.f32 0.6931472, %v1080_v24 }
 0x455   :  { %v760_v32 = vsub.f32 %v1382_v63, %v734_v31 }
 0x456   :  { %v1082_v56 = vpop.eup %1081  ;;  %v767_v33 = vsub.f32 %v1392_v8, %v748_v15 }
 0x457   :  { %v1084_v34 = vpop.eup %1083  ;;  %776 = vst [vmem:[#allocation8 + $0x28] sm:$0xff] %v760_v32  ;;  %v750_v18 = vmul.f32 0.6931472, %v1082_v56 }
 0x458   :  { %783 = vst [vmem:[#allocation8 + $0x60] sm:$0xff] %v767_v33  ;;  %v752_v35 = vmul.f32 0.6931472, %v1084_v34 }
 0x459   :  { %v768_v55 = vsub.f32 %v1389_v7, %v750_v18 }
 0x45a   :  { %v1086_v38 = vpop.eup %1085  ;;  %v769_v0 = vsub.f32 %v1397_v22, %v752_v35 }
 0x45b   :  { %784 = vst [vmem:[#allocation8 + $0x68] sm:$0xff] %v768_v55  ;;  %v754_v39 = vmul.f32 0.6931472, %v1086_v38 }
 0x45c   :  { %785 = vst [vmem:[#allocation8 + $0x70] sm:$0xff] %v769_v0 }
 0x45d   :  { %v770_v63 = vsub.f32 %v1400_v23, %v754_v39 }
 0x45f   :  { %786 = vst [vmem:[#allocation8 + $0x78] sm:$0xff] %v770_v63 }
 0x460   :  { %1164 = shalt.err (!%p1161_p0)
}
 0x461   :  { %s1165_s10 = scalar_lea.hbm %s1437_s5, 2048 }
 0x462   :  { %p1166_p1 = scmp.ne.s32.totalorder %s1437_s5, %s1165_s10  ;;  %p1169_p2 = scmp.lt.u32.totalorder %s1165_s10, %s1437_s5 }
 0x464   :  { %p1171_p3 = pnand %p1169_p2, %p1166_p1 }
 0x466   :  { %1174 = shalt.err (!%p1171_p3)
}
 0x467   :  { %s1187_s15 = smov 128   ;;  %s1188_s16 = smov 8  }
 0x468   :  { %798 = dma.vmem_to_hbm [thread:$0]  %s793_s6, 2048, %s1437_s5, [#allocation4], %s1187_s15, %s1187_s15, %s1188_s16  }
 0x469   :  { %1179 = dma.done.wait [#allocation4], 2048  }
 0x46a   :  { %1180 = vsyncadd [#allocation4], 4294965248 }
 0x46b   :  { %802 = vsyncpa [#allocation3], 1 }
 0x46c   :  { %803 = vsyncpa [#allocation6], 1 }
 0x46d   :  { %804 = vsyncpa [#allocation4], 1 }

</bundles_post_ra>
